<compile_context>
chip_gen: v7x
topology: tpu7x:2x2x1
jax: 0.10.0
libtpu: 0.0.40
codegen_flags: <defaults>
</compile_context>

<pallas_src>
import functools

import jax
import jax.numpy as jnp
from jax.experimental import pallas as pl
from jax.experimental.pallas import tpu as pltpu


def _conv1x1_kernel(x_ref, w_ref, b_ref, o_ref, *, precision):
    # x_ref: (B_blk, C_in, T)   w_ref: (TN, C_in)   b_ref: (TN, 1)
    # o_ref: (B_blk, TN, T)
    w = w_ref[...]
    bias = b_ref[...]
    # Static unroll over the folded batch rows (B_blk is small); each row is a
    # lane-preserving 2-D matmul, so no in-kernel transposes are generated.
    # (For C_in <= 8 this could be done as VPU FMAs instead of an MXU dot, but
    # the kernel is memory-bound at those sizes.)
    for b in range(x_ref.shape[0]):
        acc = jnp.dot(w, x_ref[b], preferred_element_type=jnp.float32,
                      precision=precision)
        o_ref[b] = (acc + bias).astype(o_ref.dtype)


def _round_up(a, b):
    return -(-a // b) * b


def _pick_vmem_limit():
    cap = 64 * 1024 * 1024
    try:
        cap = int(getattr(pltpu.get_tpu_info(), "vmem_capacity_bytes", cap))
    except Exception:
        pass
    # Leave headroom for compiler-internal scratch: 96 MiB on v5e/v6e
    # (128 MiB physical), 48 MiB on v7x (64 MiB physical).
    return int(cap * 0.75)


def _choose_tiling(B, C_in, C_out, HW, itemsize, vmem_limit):
    LANE = 128
    # ---- lane (HW) tile: as large as possible, multiple of 128 ----
    if HW <= LANE:
        t = HW                                  # equals full dim -> legal layout
    else:
        t = min(8192, _round_up(HW, LANE))

    # ---- C_out (N) tile: keep the full weight resident unless it is huge ----
    if C_out * C_in * itemsize > 8 * 1024 * 1024 and C_out >= 256:
        tn = 256                                # MXU-width N tiles on v6e/v7x
    else:
        tn = C_out
    w_block_bytes = tn * C_in * itemsize + tn * itemsize

    budget = int(vmem_limit * 0.45)             # double-buffered x/out + weight

    def blocks_bytes(b_blk, t_):
        return 2 * b_blk * t_ * (C_in + tn) * itemsize

    # Shrink the lane tile only if even a single batch row does not fit.
    while t > LANE and blocks_bytes(1, t) + w_block_bytes > budget:
        t = max(LANE, _round_up(t // 2, LANE))

    # ---- batch folding: amortize the ~0.35 us per-grid-step overhead ----
    target = 2 * 1024 * 1024                    # aim for >= 2 MiB DMA per step
    divisors = [d for d in range(1, min(B, 16) + 1) if B % d == 0]
    b_blk = 1
    for d in divisors:
        if blocks_bytes(d, t) + w_block_bytes > budget:
            break
        b_blk = d
        if d * t * (C_in + tn) * itemsize >= target:
            break

    # ---- keep >= 2 parallel grid steps so both v7x TensorCores get work ----
    n_hw = -(-HW // t)
    n_n = -(-C_out // tn)
    while b_blk > 1 and (B // b_blk) * n_n * n_hw < 2:
        b_blk = max(d for d in divisors if d < b_blk)

    return b_blk, tn, t


def linear_1x1_conv(x_nchw, weight, bias, *,
                    precision=jax.lax.Precision.HIGHEST):
    """1x1 conv with bias, matching torch.nn.Conv2d(c_in, c_out, 1).

    x_nchw: (B, C_in, H, W)
    weight: (C_out, C_in, 1, 1)   (torch Conv2d layout)
    bias:   (C_out,)
    returns (B, C_out, H, W)
    """
    B, C_in, H, W = x_nchw.shape
    C_out = weight.shape[0]
    HW = H * W
    itemsize = jnp.dtype(x_nchw.dtype).itemsize

    vmem_limit = _pick_vmem_limit()
    b_blk, tn, t = _choose_tiling(B, C_in, C_out, HW, itemsize, vmem_limit)

    x_mat = x_nchw.reshape(B, C_in, HW)         # free reshape (contiguous)
    w_mat = weight.reshape(C_out, C_in)         # no transpose
    b_mat = bias.reshape(C_out, 1)

    grid = (B // b_blk, -(-C_out // tn), -(-HW // t))

    # Weight / bias never change block index; single-buffer them when the
    # saved VMEM is meaningful (halves the resident-weight footprint).
    wb_mode = {}
    if C_out * C_in * itemsize >= 256 * 1024:
        wb_mode = dict(pipeline_mode=pl.Buffered(1))

    kernel = functools.partial(_conv1x1_kernel, precision=precision)

    out = pl.pallas_call(
        kernel,
        out_shape=jax.ShapeDtypeStruct((B, C_out, HW), x_mat.dtype),
        grid_spec=pltpu.PrefetchScalarGridSpec(
            num_scalar_prefetch=0,
            grid=grid,
            in_specs=[
                pl.BlockSpec((b_blk, C_in, t), lambda bi, ni, hi: (bi, 0, hi)),
                pl.BlockSpec((tn, C_in), lambda bi, ni, hi: (ni, 0), **wb_mode),
                pl.BlockSpec((tn, 1), lambda bi, ni, hi: (ni, 0), **wb_mode),
            ],
            out_specs=pl.BlockSpec((b_blk, tn, t),
                                   lambda bi, ni, hi: (bi, ni, hi)),
        ),
        compiler_params=pltpu.CompilerParams(
            dimension_semantics=("parallel", "parallel", "parallel"),
            vmem_limit_bytes=vmem_limit),
        cost_estimate=pl.CostEstimate(
            flops=2 * B * HW * C_in * C_out,
            transcendentals=0,
            bytes_accessed=itemsize * (B * HW * (C_in + C_out)
                                       + C_out * C_in + C_out),
        ),
    )(x_mat, w_mat, b_mat)

    return out.reshape(B, C_out, H, W)


if __name__ == "__main__":
    key = jax.random.PRNGKey(0)
    kx, kw, kb = jax.random.split(key, 3)

    B, C_in, C_out, Hs, Ws = 2, 4, 8, 16, 16

    x = jax.random.normal(kx, (B, C_in, Hs, Ws), dtype=jnp.float32)
    # Deterministic parameter init (mimicking torch's uniform fan-in scaling).
    bound = 1.0 / (C_in ** 0.5)
    weight = jax.random.uniform(kw, (C_out, C_in, 1, 1), jnp.float32,
                                -bound, bound)
    bias = jax.random.uniform(kb, (C_out,), jnp.float32, -bound, bound)

    out = jax.block_until_ready(linear_1x1_conv(x, weight, bias))

    # Reference check against plain-JAX 1x1 conv semantics.
    ref = jnp.einsum("bchw,oc->bohw", x, weight.reshape(C_out, C_in),
                     precision=jax.lax.Precision.HIGHEST) \
        + bias.reshape(1, C_out, 1, 1)
    assert out.shape == (B, C_out, Hs, Ws)
    assert jnp.allclose(out, ref, atol=1e-5, rtol=1e-5)

    print("KERNEL_OK")
</pallas_src>

<mosaic_0001>
module attributes {stable_mosaic.version = 11 : i64} {
  func.func @_conv1x1_kernel(%arg0: i32, %arg1: i32, %arg2: i32, %arg3: memref<1x4x256xf32, #tpu.memory_space<vmem>>, %arg4: memref<8x4xf32, #tpu.memory_space<vmem>>, %arg5: memref<8x1xf32, #tpu.memory_space<vmem>>, %arg6: memref<1x8x256xf32, #tpu.memory_space<vmem>>) attributes {dimension_semantics = [#tpu.dimension_semantics<parallel>, #tpu.dimension_semantics<parallel>, #tpu.dimension_semantics<parallel>], iteration_bounds = array<i64: 2, 1, 1>, scalar_prefetch = 0 : i64, scratch_operands = 0 : i64, tpu.core_type = #tpu.core_type<tc>, window_params = [{transform_indices = @transform_0, window_bounds = array<i64: 1, 4, 256>}, {transform_indices = @transform_1, window_bounds = array<i64: 8, 4>}, {transform_indices = @transform_2, window_bounds = array<i64: 8, 1>}, {transform_indices = @transform_3, window_bounds = array<i64: 1, 8, 256>}]} {
    %c0 = arith.constant 0 : index
    %c0_0 = arith.constant 0 : index
    %0 = vector.load %arg4[%c0, %c0_0] : memref<8x4xf32, #tpu.memory_space<vmem>>, vector<8x4xf32>
    %c0_1 = arith.constant 0 : index
    %c0_2 = arith.constant 0 : index
    %1 = vector.load %arg5[%c0_1, %c0_2] : memref<8x1xf32, #tpu.memory_space<vmem>>, vector<8x1xf32>
    %c0_3 = arith.constant 0 : index
    %c0_4 = arith.constant 0 : index
    %c0_5 = arith.constant 0 : index
    %2 = vector.load %arg3[%c0_3, %c0_4, %c0_5] : memref<1x4x256xf32, #tpu.memory_space<vmem>>, vector<1x4x256xf32>
    %3 = vector.shape_cast %2 : vector<1x4x256xf32> to vector<4x256xf32>
    %cst = arith.constant dense<0.000000e+00> : vector<8x256xf32>
    %4 = tpu.matmul %0, %3, %cst {dimension_numbers = #tpu.dot_dimension_numbers<[1], [0], [0], [1], [0, 0, 1, 1], [], []>, precision = #tpu.contract_precision<fp32>} : vector<8x4xf32>, vector<4x256xf32>, vector<8x256xf32> -> vector<8x256xf32>
    %5 = vector.broadcast %1 : vector<8x1xf32> to vector<8x256xf32>
    %6 = arith.addf %4, %5 : vector<8x256xf32>
    %c0_6 = arith.constant 0 : index
    %c0_7 = arith.constant 0 : index
    %c0_8 = arith.constant 0 : index
    %7 = vector.load %arg6[%c0_6, %c0_7, %c0_8] : memref<1x8x256xf32, #tpu.memory_space<vmem>>, vector<1x8x256xf32>
    %8 = vector.shape_cast %7 : vector<1x8x256xf32> to vector<8x256xf32>
    %9 = vector.shape_cast %6 : vector<8x256xf32> to vector<1x8x256xf32>
    tpu.vector_store %arg6[%c0_6, %c0_7, %c0_8], %9 {strides = array<i32>} : memref<1x8x256xf32, #tpu.memory_space<vmem>>, vector<1x8x256xf32>,
    return
  }
  func.func @transform_0(%arg0: i32, %arg1: i32, %arg2: i32) -> (i32, i32, i32) {
    %c0_i32 = arith.constant 0 : i32
    %c0_i32_0 = arith.constant 0 : i32
    return %arg0, %c0_i32, %arg2 : i32, i32, i32
  }
  func.func @transform_1(%arg0: i32, %arg1: i32, %arg2: i32) -> (i32, i32) {
    %c0_i32 = arith.constant 0 : i32
    %c0_i32_0 = arith.constant 0 : i32
    return %arg1, %c0_i32 : i32, i32
  }
  func.func @transform_2(%arg0: i32, %arg1: i32, %arg2: i32) -> (i32, i32) {
    %c0_i32 = arith.constant 0 : i32
    %c0_i32_0 = arith.constant 0 : i32
    return %arg1, %c0_i32 : i32, i32
  }
  func.func @transform_3(%arg0: i32, %arg1: i32, %arg2: i32) -> (i32, i32, i32) {
    %c0_i32 = arith.constant 0 : i32
    return %arg0, %arg1, %arg2 : i32, i32, i32
  }
}

</mosaic_0001>

<bundles_post_ra>
// kernel: tpu_custom_call.1
= control target key start
LH: loop header
LB: loop body
LE: loop exit
PB: predicated region body
PF: predicated region fallthrough
CT: control target
= control target key end

     0   :  { %8 = vsyncpa [#allocation3], 0  ;;  %s1168_s0 = inlined_call_operand.vmem [shape: f32[2,4,256], index: 0, kind: input, shape index: {}]   ;;  %s1169_s1 = inlined_call_operand.vmem [shape: f32[8,4], index: 1, kind: input, shape index: {}]   ;;  %s1170_s2 = inlined_call_operand.vmem [shape: f32[8,1], index: 2, kind: input, shape index: {}]   ;;  %s1171_s3 = inlined_call_operand.hbm [shape: f32[2,8,256], index: 3, kind: output, shape index: {}]  }
   0x1   :  { %10 = vsyncpa [#allocation3 + $0x1], 0  ;;  %s1050_s12 = smov 0   ;;  %s1052_s13 = smov 0  }
   0x2   :  { %s1054_s14 = smov 0   ;;  %s1056_s15 = smov 0  }
   0x3   :  { %s1058_s16 = smov 0   ;;  %s1060_s17 = smov 0  }
   0x4 LB: > { %s859_s18 = sadd.s32 4294967295, %s1025_s17   ;;  %s860_s19 = sadd.s32 4294967294, %s1025_s17   ;;  %s1025_s17 = sphi %s1060_s17, %s16_s17   ;;  %s1021_s16 = sphi %s1058_s16, %s1178_s16   ;;  %s1017_s15 = sphi %s1056_s15, %s1177_s15   ;;  %s1013_s14 = sphi %s1054_s14, %s1176_s14   ;;  %s1009_s13 = sphi %s1052_s13, %s1175_s13   ;;  %s1005_s12 = sphi %s1050_s12, %s1174_s12  }
   0x5   : > { %s35_s20 = sadd.s32 1, %s1021_s16  ;;  %s126_s21 = sadd.s32 1, %s1013_s14 }
   0x6   : > { %p37_p0 = scmp.ge.s32.totalorder %s35_s20, 2  ;;  %p136_p1 = scmp.ne.s32.totalorder %s1013_s14, %s1009_s13 }
   0x7   : > { %p137_p2 = scmp.eq.s32.totalorder %s859_s18, 1  ;;  %p142_p3 = scmp.ne.s32.totalorder %s1009_s13, %s1005_s12 }
   0x8   : > { %s1180_s20 = smov (%p37_p0, %s35_s20), 0  ;;  %p143_p5 = scmp.eq.s32.totalorder %s860_s19, 1 }
   0x9   : > { %p1090_p4 = por %p137_p2, %p136_p1  ;;  %s119_s23 = ssub.s32 %s1021_s16, %s1180_s20 }
   0xa   : > { %p865_p6 = scmp.ge.s32.totalorder %s1025_s17, 1  ;;  %p124_p7 = scmp.eq.s32.totalorder %s119_s23, 0 }
   0xb   : > { %p1097_p8 = por %p143_p5, %p142_p3  ;;  %p188_p9 = scmp.lt.s32.totalorder %s1025_s17, 3 }
   0xc   : > { %s1103_s25 = scalar_select %p124_p7, %s1013_s14, %s126_s21  }
   0xd   : > { %p189_p10 = pnand %p865_p6, %p188_p9 }
   0xe   : > { %p225_p11 = scmp.lt.s32.totalorder (!%p189_p10), %s1017_s15, 1  ;;  %v243_v0 = vld [vmem:[%s1169_s1] sm:$0xff] (!%p189_p10)  ;;  %vm253_vm0 = vcmask (!%p189_p10), 31744   ;;  %v1027_v1 = vmov (!%p189_p10), 0.0   ;;  %v1028_v5 = vmov (!%p189_p10), 0   ;;  %vm257_vm1 = vcmask (!%p189_p10), 1043456  }
   0xf   : > { %192 = sbr.rel (%p189_p10) target bundleno = 281 (0x119), region = 32  ;;  %328 = vmatprep.mubr.f32.mxu1 (!%p189_p10), %v1027_v1  ;;  %565 = vmatprep.mubr.f32.mxu0 (!%p189_p10), %v1027_v1  ;;  %v255_v2 = vsel (!%p189_p10), %vm253_vm0, %v243_v0, 0  ;;  %v244_v3 = vld [vmem:[%s1170_s2] sm:$0xff] (!%p189_p10)  ;;  %s221_s8 = sand.u32 (!%p189_p10), 1, %s1009_s13  }
  0x10   : > { %v329_v4 = vand.u32 (!%p189_p10), 4294901760, %v255_v2  ;;  %945 = vset.pattern.permute.xlu0 (!%p189_p10), %v1028_v5  ;;  %s866_s9 = sshll.u32 (!%p189_p10), %s221_s8, 4  ;;  %s875_s10 = sshll.u32 (!%p189_p10), %s1017_s15, 8 }
  0x11   : > { %248 = vperm.xlu0 (!%p189_p10), %945, %v244_v3   ;;  %s223_s11 = scalar_lea.vmem (!%p189_p10), [#allocation2], %s866_s9  ;;  %s1121_s23 = scalar_lea.hbm (!%p189_p10), %s1171_s3, %s875_s10 }
  0x12   : > { %v330_v6 = vsub.f32 (!%p189_p10), %v255_v2, %v329_v4  ;;  %s748_s18 = sshll.u32 (!%p189_p10), %s223_s11, 4  ;;  %s730_s26 = scalar_lea.sflag (!%p189_p10), [#allocation3], %s221_s8  ;;  %s1123_s18 = int_to_ptr.vmem [resolvable:$true] %s748_s18 }
  0x13   : > { %s947_s27 = scalar_lea.vmem (!%p189_p10), %s1123_s18, 256 }
  0x14   : > { %v331_v8 = vand.u32 (!%p189_p10), 4294901760, %v330_v6  ;;  %p948_p12 = scmp.ne.s32.totalorder (!%p189_p10), %s1123_s18, %s947_s27 }
  0x16   : > { %s226_s30 = scalar_select %p225_p11, %s1017_s15, 1  ;;  %v332_v12 = vsub.f32 %v330_v6, %v331_v8 }
  0x17   : > { %p949_p13 = pnand %p948_p12, %p1090_p4  ;;  %s1029_s15 = smov [#allocation2]  }
  0x18   : > { %s874_s4 = sshll.u32 %s226_s30, 3  ;;  %v333_v16 = vand.u32 4294901760, %v332_v12  ;;  %s951_s28 = sshll.u32 %s1029_s15, 4  ;;  %s952_s28 = int_to_ptr.vmem [resolvable:$false] %s951_s28 }
  0x19   : > { %s232_s7 = scalar_lea.vmem %s1168_s0, %s874_s4  ;;  %p950_p0 = pneg %p949_p13 }
  0x1a   : > { %v245_v7 = vld [vmem:[%s232_s7] sm:$0xff]  ;;  %s953_s29 = scalar_lea.vmem %s952_s28, 512  ;;  %p954_p1 = scmp.lt.s32.totalorder %s1123_s18, %s952_s28 }
  0x1b   : > { %v252_v9 = vcombine.high %v245_v7, %v245_v7  ;;  %v258_v10 = vsel %vm257_vm1, %v245_v7, 0  ;;  %p955_p2 = scmp.lt.s32.totalorder %s953_s29, %s947_s27 }
  0x1c   : > { %v264_v11 = vand.u32 4294901760, %v258_v10 }
  0x1d   : > { %v260_v13 = vsel %vm257_vm1, %v252_v9, 0  ;;  %p956_p3 = por %p955_p2, %p954_p1 }
  0x1e   : > { %v262_v14 = vand.u32 4294901760, %v260_v13  ;;  %v347_v15 = vsub.f32 %v258_v10, %v264_v11 }
  0x1f   : > { %p957_p5 = pnand %p956_p3, %p950_p0 }
  0x20   : > { %263 = vmatprep.subr.mxu1 %v262_v14  ;;  %500 = vmatprep.subr.mxu0 %v262_v14  ;;  %v341_v17 = vsub.f32 %v260_v13, %v262_v14  ;;  %v348_v18 = vand.u32 4294901760, %v347_v15 }
  0x21   : > { %265 = vmatpush1.msra.mxu1 %v264_v11  ;;  %502 = vmatpush1.msra.mxu0 %v264_v11 }
  0x22   : > { %334 = vmatmul.mubr.f32.vlgmr.msra.gmra.mrb[0].mxu1 %v333_v16  ;;  %569 = vmatmul.mubr.f32.vlgmr.msra.gmra.mrb[0].mxu0 %v331_v8  ;;  %v342_v19 = vand.u32 4294901760, %v341_v17  ;;  %v349_v20 = vsub.f32 %v347_v15, %v348_v18 }
  0x23   : > { %414 = vmatprep.mubr.f32.mxu1 %v1027_v1  ;;  %645 = vmatprep.mubr.f32.mxu0 %v1027_v1 }
  0x24   : > { %v343_v21 = vsub.f32 %v341_v17, %v342_v19  ;;  %578 = vmatprep.subr.mxu0 %v342_v19  ;;  %v350_v22 = vand.u32 4294901760, %v349_v20 }
  0x25   : > { %582 = vmatpush1.msra.mxu0 %v348_v18 }
  0x26   : > { %v344_v23 = vand.u32 4294901760, %v343_v21  ;;  %654 = vmatprep.subr.mxu0 %v262_v14 }
  0x28   : > { %345 = vmatprep.subr.mxu1 %v344_v23 }
  0x29   : > { %351 = vmatpush1.msra.mxu1 %v350_v22 }
  0x2a   : > { %416 = vmatmul.mubr.f32.vlgmr.msra.gmra.mrb[0].mxu1 %v329_v4  ;;  %647 = vmatmul.mubr.f32.vlgmr.msra.gmra.mrb[0].mxu0 %v329_v4 }
  0x2b   : > { %424 = vmatprep.subr.mxu1 %v341_v17  ;;  %490 = vmatprep.mubr.f32.mxu1 %v1027_v1 }
  0x2c   : > { %427 = vmatpush1.msra.mxu1 %v347_v15  ;;  %656 = vmatpush1.msra.mxu0 %v264_v11 }
  0x2d   : > { %719 = vmatprep.mubr.f32.mxu0 %v1027_v1 }
  0x32   : > { %493 = vmatmul.mubr.f32.vlgmr.msra.gmra.mrb[0].mxu1 %v330_v6  ;;  %721 = vmatmul.mubr.f32.vlgmr.msra.gmra.mrb[0].mxu0 %v329_v4 }
  0x90   : > { %v249_v24 = vpop.permute.xlu0 %248 }
 0x105   : > { %v494_v25 = vpop.f32.mrb[0].mxu1  ;;  %v722_v26 = vpop.f32.mrb[0].mxu0 }
 0x106   : > { %v876_v27 = vadd.f32 %v494_v25, %v249_v24  ;;  %v496_v28 = vpop.f32.mrb[1].mxu1  ;;  %v724_v29 = vpop.f32.mrb[1].mxu0 }
 0x107   : > { %v878_v30 = vadd.f32 %v496_v28, %v249_v24 }
 0x108   : > { %v877_v31 = vadd.f32 %v876_v27, %v722_v26 }
 0x109   : > { %v879_v32 = vadd.f32 %v878_v30, %v724_v29 }
 0x10a   : > { %727 = vst [vmem:[%s223_s11] sm:$0xff] %v877_v31 }
 0x10b   : > { %728 = vst [vmem:[%s223_s11 + $0x8] sm:$0xff] %v879_v32 }
 0x10c   : > { %960 = shalt.err (!%p957_p5)
}
 0x10d   : > { %s961_s30 = scalar_lea.hbm %s1121_s23, 256  ;;  %s965_s6 = scalar_lea.hbm %s1171_s3, 512 }
 0x10e   : > { %p962_p6 = scmp.ne.s32.totalorder %s1121_s23, %s961_s30  ;;  %p966_p10 = scmp.lt.u32.totalorder %s1121_s23, %s1171_s3 }
 0x10f   : > { %p967_p11 = scmp.lt.u32.totalorder %s965_s6, %s961_s30  ;;  %p969_p13 = scmp.lt.u32.totalorder %s961_s30, %s1121_s23 }
 0x110   : > { %p963_p7 = pnand %p962_p6, %p1090_p4 }
 0x111   : > { %p968_p12 = por %p967_p11, %p966_p10 }
 0x112   : > { %p964_p9 = pneg %p963_p7 }
 0x113   : > { %p970_p0 = por %p969_p13, %p968_p12 }
 0x115   : > { %p971_p1 = pnand %p970_p0, %p964_p9 }
 0x117   : > { %974 = shalt.err (!%p971_p1)
}
 0x118   : > { %888 = dma.vmem_to_hbm [thread:$0]  (%p1090_p4), %s1123_s18, 256, %s1121_s23, %s730_s26  }
 0x119 PF: > { %p894_p2 = scmp.ge.s32.totalorder %s1025_s17, 2  ;;  %s760_s9 = sand.u32 1, %s1005_s12  }
 0x11a   : > { %s761_s10 = scalar_lea.sflag [#allocation3], %s760_s9 }
 0x11b   : > { %p891_p3 = pnand %p894_p2, %p1097_p8 }
 0x11d   : > { %1000 = dma.done.wait (!%p891_p3), %s761_s10, 256  }
 0x11e   : > { %1002 = vsyncadd (!%p891_p3), %s761_s10, 4294967040  ;;  %s16_s17 = sadd.s32 1, %s1025_s17   ;;  %s1174_s12 = smov %s1009_s13 }
 0x11f   : > { %p13_p5 = scmp.ge.s32.totalorder %s16_s17, 4   ;;  %s1175_s13 = smov %s1013_s14 }
 0x120   : > { %s1176_s14 = smov %s1103_s25  ;;  %s1177_s15 = smov %s1021_s16 }
 0x121   : > { %s1178_s16 = smov %s1180_s20  ;;  %15 = sbr.rel (!%p13_p5) target bundleno = 4 (0x4), region = 73 }
 0x128   :  { %766 = vsyncpa [#allocation3], 1 }
 0x129   :  { %768 = vsyncpa [#allocation3 + $0x1], 1 }

</bundles_post_ra>
